<compile_context>
chip_gen: v7x
topology: tpu7x:2x2x1
jax: 0.10.0
libtpu: 0.0.40
codegen_flags: <defaults>
</compile_context>

<pallas_src>
import jax
import jax.numpy as jnp
from jax.experimental import pallas as pl
from jax.experimental.pallas import tpu as pltpu


def _round_up(n: int, m: int) -> int:
    return ((n + m - 1) // m) * m


def _linear_sigmoid_kernel(x_ref, w_ref, b_ref, o_ref):
    """One batch tile.

    x_ref: (TB, F) f32 VMEM  -- TB samples for this grid step (pipelined)
    w_ref: (8, F)  f32 VMEM  -- weight row replicated over 8 sublanes (resident)
    b_ref: (1,)    f32 SMEM  -- scalar bias
    o_ref: (1, TB) f32 VMEM  -- lane-dense output slab (sample index on lanes)
    """
    # (8, F) · (TB, F)^T -> (8, TB) on the MXU.  All 8 rows are identical (the weight
    # row is replicated), so row 0 holds w·x_i for every sample i of the tile, already
    # in lane-dense (1, TB) layout -- no masked (TB, 1) stores, no relayout needed.
    z = jax.lax.dot_general(
        w_ref[...],
        x_ref[...],
        dimension_numbers=(((1,), (1,)), ((), ())),
        preferred_element_type=jnp.float32,
    )
    z0 = z[0:1, :] + b_ref[0]  # scalar bias from SMEM, broadcast over lanes

    # sigmoid(z) = 1 / (1 + exp(-z)); exp and approx-reciprocal both go to the EUP,
    # leaving the VPU free (no f32 divide on the vector ALUs).
    e = jnp.exp(-z0)
    o_ref[...] = pl.reciprocal(1.0 + e, approx=True)


@jax.jit
def linear_sigmoid(x, w, b):
    """x: (B, F) f32, w: (F, 1) f32, b: (1,) f32  ->  (B, 1) f32 == sigmoid(x @ w + b)."""
    B, F = x.shape
    assert w.shape == (F, 1) and b.shape == (1,)

    # Batch tile: multiple of 128 (lane-dense output), capped at 512 rows.
    TB = max(128, min(512, _round_up(B, 128)))
    B_pad = _round_up(B, TB)
    grid = (B_pad // TB,)

    x_pad = x if B_pad == B else jnp.pad(x, ((0, B_pad - B), (0, 0)))
    # Replicate the single weight row across 8 sublanes -> well-formed MXU operand.
    w8 = jnp.tile(w.reshape(1, F), (8, 1))

    out = pl.pallas_call(
        _linear_sigmoid_kernel,
        out_shape=jax.ShapeDtypeStruct((1, B_pad), jnp.float32),
        grid_spec=pltpu.PrefetchScalarGridSpec(
            num_scalar_prefetch=0,
            grid=grid,
            in_specs=[
                # x: batch-tiled, auto double-buffered across grid steps.
                pl.BlockSpec((TB, F), lambda i: (i, 0)),
                # w: same block every step -> stays resident in VMEM.
                pl.BlockSpec((8, F), lambda i: (0, 0)),
                # bias: whole (1,) array in SMEM, read as a scalar.
                pl.BlockSpec(memory_space=pltpu.MemorySpace.SMEM),
            ],
            # Lane-dense (1, TB) output slab per grid step.
            out_specs=pl.BlockSpec((1, TB), lambda i: (0, i)),
        ),
        compiler_params=pltpu.CompilerParams(
            # Batch tiles are independent -> shard across TensorCores on v7x.
            dimension_semantics=("parallel",),
        ),
        cost_estimate=pl.CostEstimate(
            flops=2 * B_pad * F,
            transcendentals=2 * B_pad,
            bytes_accessed=4 * (B_pad * F + 8 * F + 1 + B_pad),
        ),
    )(x_pad, w8, b)

    # Back to the PyTorch layout (B, 1); padded rows are dropped.
    return out[0, :B].reshape(B, 1)


if __name__ == "__main__":
    # Small shapes consistent with the module: input_size = 32, output_size = 1.
    batch = 8
    input_size = 32
    output_size = 1

    key = jax.random.PRNGKey(0)
    kx, kw, kb = jax.random.split(key, 3)

    x = jax.random.normal(kx, (batch, input_size), dtype=jnp.float32)

    # torch.nn.Linear default init: uniform(-1/sqrt(in_features), 1/sqrt(in_features))
    bound = 1.0 / (input_size ** 0.5)
    w = jax.random.uniform(kw, (input_size, output_size),
                           minval=-bound, maxval=bound, dtype=jnp.float32)
    b = jax.random.uniform(kb, (output_size,),
                           minval=-bound, maxval=bound, dtype=jnp.float32)

    y = linear_sigmoid(x, w, b)
    jax.block_until_ready(y)

    # Pure-JAX reference check (tolerance loosened for approx EUP reciprocal).
    y_ref = jax.nn.sigmoid(x @ w + b[None, :])
    assert y.shape == (batch, output_size)
    assert jnp.allclose(y, y_ref, atol=2e-3, rtol=2e-3), "mismatch vs reference"

    print("KERNEL_OK")
</pallas_src>

<mosaic_0001>
module attributes {stable_mosaic.version = 11 : i64} {
  func.func @_linear_sigmoid_kernel(%arg0: i32, %arg1: memref<128x32xf32, #tpu.memory_space<vmem>>, %arg2: memref<8x32xf32, #tpu.memory_space<vmem>>, %arg3: memref<1xf32, #tpu.memory_space<smem>>, %arg4: memref<1x128xf32, #tpu.memory_space<vmem>>) attributes {dimension_semantics = [#tpu.dimension_semantics<parallel>], iteration_bounds = array<i64: 1>, scalar_prefetch = 0 : i64, scratch_operands = 0 : i64, tpu.core_type = #tpu.core_type<tc>, window_params = [{transform_indices = @transform_0, window_bounds = array<i64: 128, 32>}, {pipeline_mode = #tpu.pipeline_mode<synchronous>, transform_indices = @transform_1, window_bounds = array<i64: 8, 32>}, {transform_indices = @transform_2, window_bounds = array<i64: 1>}, {transform_indices = @transform_3, window_bounds = array<i64: 1, 128>}]} {
    %c0 = arith.constant 0 : index
    %c0_0 = arith.constant 0 : index
    %0 = vector.load %arg2[%c0, %c0_0] : memref<8x32xf32, #tpu.memory_space<vmem>>, vector<8x32xf32>
    %c0_1 = arith.constant 0 : index
    %c0_2 = arith.constant 0 : index
    %1 = vector.load %arg1[%c0_1, %c0_2] : memref<128x32xf32, #tpu.memory_space<vmem>>, vector<128x32xf32>
    %cst = arith.constant dense<0.000000e+00> : vector<8x128xf32>
    %2 = tpu.matmul %0, %1, %cst {dimension_numbers = #tpu.dot_dimension_numbers<[1], [1], [0], [0], [0, 0, 1, 0], [], []>} : vector<8x32xf32>, vector<128x32xf32>, vector<8x128xf32> -> vector<8x128xf32>
    %3 = vector.extract_strided_slice %2 {offsets = [0, 0], sizes = [1, 128], strides = [1, 1]} : vector<8x128xf32> to vector<1x128xf32>
    %c0_3 = arith.constant 0 : index
    %4 = memref.load %arg3[%c0_3] : memref<1xf32, #tpu.memory_space<smem>>
    %5 = vector.broadcast %4 : f32 to vector<1x128xf32>
    %6 = arith.addf %3, %5 : vector<1x128xf32>
    %cst_4 = arith.constant 0.000000e+00 : f32
    %7 = vector.broadcast %cst_4 : f32 to vector<1x128xf32>
    %8 = arith.subf %7, %6 : vector<1x128xf32>
    %9 = math.exp %8 : vector<1x128xf32>
    %cst_5 = arith.constant 1.000000e+00 : f32
    %10 = vector.broadcast %cst_5 : f32 to vector<1x128xf32>
    %11 = arith.addf %10, %9 : vector<1x128xf32>
    %12 = tpu.reciprocal %11 {approx = true} : vector<1x128xf32> -> vector<1x128xf32>
    %c0_6 = arith.constant 0 : index
    %c0_7 = arith.constant 0 : index
    %13 = vector.load %arg4[%c0_6, %c0_7] : memref<1x128xf32, #tpu.memory_space<vmem>>, vector<1x128xf32>
    tpu.vector_store %arg4[%c0_6, %c0_7], %12 {strides = array<i32>} : memref<1x128xf32, #tpu.memory_space<vmem>>, vector<1x128xf32>,
    return
  }
  func.func @transform_0(%arg0: i32) -> (i32, i32) {
    %c0_i32 = arith.constant 0 : i32
    %c0_i32_0 = arith.constant 0 : i32
    return %arg0, %c0_i32 : i32, i32
  }
  func.func @transform_1(%arg0: i32) -> (i32, i32) {
    %c0_i32 = arith.constant 0 : i32
    %c0_i32_0 = arith.constant 0 : i32
    %c0_i32_1 = arith.constant 0 : i32
    return %c0_i32, %c0_i32_0 : i32, i32
  }
  func.func @transform_2(%arg0: i32) -> i32 {
    %c0_i32 = arith.constant 0 : i32
    %c0_i32_0 = arith.constant 0 : i32
    return %c0_i32 : i32
  }
  func.func @transform_3(%arg0: i32) -> (i32, i32) {
    %c0_i32 = arith.constant 0 : i32
    %c0_i32_0 = arith.constant 0 : i32
    return %c0_i32, %arg0 : i32, i32
  }
}

</mosaic_0001>

<bundles_post_ra>
// kernel: linear_sigmoid.1
= control target key start
LH: loop header
LB: loop body
LE: loop exit
PB: predicated region body
PF: predicated region fallthrough
CT: control target
= control target key end

     0   :  { %vm32_vm0 = vcmask 261120   ;;  %v275_v0 = vmov 0.0|0.0   ;;  %vm276_vm2 = vmmov 0   ;;  %v277_v4 = vmov 0.0   ;;  %s378_s0 = inlined_call_operand.vmem [shape: f32[128,32], index: 0, kind: input, shape index: {}]   ;;  %s379_s1 = inlined_call_operand.vmem [shape: f32[8,32], index: 1, kind: input, shape index: {}]   ;;  %s380_s2 = inlined_call_operand.<no memory space> [shape: f32[1], index: 2, kind: input, shape index: {}]   ;;  %s381_s3 = inlined_call_operand.vmem [shape: f32[1,128], index: 3, kind: output, shape index: {}]  }
   0x1   :  { %236 = vmatprep.subr.bf16.mxu0 %v275_v0  ;;  %v16_v1 = vld [vmem:[%s378_s0] sm:$0xff]  ;;  %v17_v2 = vld [vmem:[%s378_s0 + $0x8] sm:$0xff]  ;;  %vm306_vm1 = vmpackc.low %vm32_vm0, %vm32_vm0  ;;  %233 = vmatprep.mubr.msk.f32.mxu0 %vm276_vm2, %v277_v4  ;;  %v155_v28 = vstv %s380_s2 }
   0x2   :  { %v237_v5 = vpack.c.bf16 %v17_v2, %v16_v1  ;;  %v18_v6 = vld [vmem:[%s378_s0 + $0x10] sm:$0xff]  ;;  %v19_v7 = vld [vmem:[%s378_s0 + $0x18] sm:$0xff]  ;;  %v20_v9 = vld [vmem:[%s378_s0 + $0x20] sm:$0xff] }
   0x3   :  { %v241_v8 = vpack.c.bf16 %v19_v7, %v18_v6  ;;  %v21_v10 = vld [vmem:[%s378_s0 + $0x28] sm:$0xff]  ;;  %v22_v12 = vld [vmem:[%s378_s0 + $0x30] sm:$0xff]  ;;  %v23_v13 = vld [vmem:[%s378_s0 + $0x38] sm:$0xff] }
   0x4   :  { %239 = vmatpush3.bf16.xpose.msk.msra.mxu0 %vm306_vm1, %v237_v5  ;;  %v245_v11 = vpack.c.bf16 %v21_v10, %v20_v9  ;;  %v249_v14 = vpack.c.bf16 %v23_v13, %v22_v12  ;;  %v24_v15 = vld [vmem:[%s378_s0 + $0x40] sm:$0xff]  ;;  %v25_v16 = vld [vmem:[%s378_s0 + $0x48] sm:$0xff]  ;;  %v26_v18 = vld [vmem:[%s378_s0 + $0x50] sm:$0xff] }
   0x5   :  { %240 = vmatprep.subr.bf16.mxu0 %v275_v0  ;;  %v253_v17 = vpack.c.bf16 %v25_v16, %v24_v15  ;;  %v27_v19 = vld [vmem:[%s378_s0 + $0x58] sm:$0xff]  ;;  %v28_v21 = vld [vmem:[%s378_s0 + $0x60] sm:$0xff]  ;;  %v29_v22 = vld [vmem:[%s378_s0 + $0x68] sm:$0xff] }
   0x6   :  { %v257_v20 = vpack.c.bf16 %v27_v19, %v26_v18  ;;  %v261_v23 = vpack.c.bf16 %v29_v22, %v28_v21  ;;  %v30_v24 = vld [vmem:[%s378_s0 + $0x70] sm:$0xff]  ;;  %v31_v25 = vld [vmem:[%s378_s0 + $0x78] sm:$0xff]  ;;  %v15_v27 = vld [vmem:[%s379_s1] sm:$0xff] }
   0x7   :  { %v265_v26 = vpack.c.bf16 %v31_v25, %v30_v24 }
   0xc   :  { %243 = vmatpush3.bf16.xpose.msk.msra.mxu0 %vm306_vm1, %v241_v8 }
   0xd   :  { %244 = vmatprep.subr.bf16.mxu0 %v275_v0 }
  0x14   :  { %247 = vmatpush3.bf16.xpose.msk.msra.mxu0 %vm306_vm1, %v245_v11 }
  0x15   :  { %248 = vmatprep.subr.bf16.mxu0 %v275_v0 }
  0x1c   :  { %251 = vmatpush3.bf16.xpose.msk.msra.mxu0 %vm306_vm1, %v249_v14 }
  0x1d   :  { %252 = vmatprep.subr.bf16.mxu0 %v275_v0 }
  0x24   :  { %255 = vmatpush3.bf16.xpose.msk.msra.mxu0 %vm306_vm1, %v253_v17 }
  0x25   :  { %256 = vmatprep.subr.bf16.mxu0 %v275_v0 }
  0x2c   :  { %259 = vmatpush3.bf16.xpose.msk.msra.mxu0 %vm306_vm1, %v257_v20 }
  0x2d   :  { %260 = vmatprep.subr.bf16.mxu0 %v275_v0 }
  0x34   :  { %263 = vmatpush3.bf16.xpose.msk.msra.mxu0 %vm306_vm1, %v261_v23 }
  0x35   :  { %264 = vmatprep.subr.bf16.mxu0 %v275_v0 }
  0x3c   :  { %267 = vmatpush3.bf16.xpose.msk.msra.mxu0 %vm306_vm1, %v265_v26 }
  0x43   :  { %234 = vmatmul.mubr.msk.f32.vlgmr.msra.gmra.mrb[0].mxu0 %vm32_vm0, %v15_v27 }
 0x116   :  { %v150_v29 = vpop.f32.mrb[0].mxu0 }
 0x117   :  { %v156_v30 = vadd.f32 %v155_v28, %v150_v29  ;;  %v235_v31 = vpop.f32.mrb[1].mxu0 }
 0x119   :  { %v157_v32 = vsub.f32 0.0, %v156_v30 }
 0x11b   :  { %v158_v33 = vmul.f32 1.442695, %v157_v32 }
 0x11d   :  { %271 = vpow2.f32 %v158_v33 }
 0x127   :  { %v272_v34 = vpop.eup %271 }
 0x128   :  { %v160_v35 = vadd.f32 1.0, %v272_v34 }
 0x12a   :  { %273 = vrcp.f32 %v160_v35 }
 0x134   :  { %v274_v36 = vpop.eup %273 }
 0x135   :  { %162 = vst [vmem:[%s381_s3] sm:$0x1] %v274_v36 }

</bundles_post_ra>
